<compile_context>
chip_gen: v6e
topology: v6e:2x2x1
jax: 0.10.0
libtpu: 0.0.40
codegen_flags: <defaults>
</compile_context>

<pallas_src>
import numpy as np
import jax
import jax.numpy as jnp
from jax import lax
from jax.experimental import pallas as pl
from jax.experimental.pallas import tpu as pltpu


# ---------------------------------------------------------------------------
# helpers
# ---------------------------------------------------------------------------
def _choose_units(n_units, rows_per_unit, width, max_elems):
    """Number of leading 'units' (rows / planes) per grid block.

    The tile must divide n_units exactly (so every tile is full and the
    clamped halo gives a zero boundary for free) and its sublane extent must
    be a multiple of 8 or the full extent (TPU BlockSpec constraint)."""
    cands = [t for t in range(1, n_units + 1)
             if n_units % t == 0
             and ((t * rows_per_unit) % 8 == 0 or t == n_units)]
    fitting = [t for t in cands if t * rows_per_unit * width <= max_elems]
    return max(fitting) if fitting else min(cands)


def _target_elems(n_parts, n_comp, max_block_elems):
    if max_block_elems is not None:
        return int(max_block_elems)
    # Keep double-buffered (input + n_comp outputs) f32 tiles well under the
    # default scoped-VMEM limit on all generations (v5e 16MiB ... v7x 32MiB).
    budget = 10 * 1024 * 1024
    per_elem = 2 * n_parts * (1 + n_comp) * 4
    return max(8 * 128, budget // per_elem)


def _dx_scale(W, hx):
    s = np.full((1, W), 1.0 / hx, np.float32)
    s[0, W - 1] = 0.0                      # Neumann: 0 at last column
    return jnp.asarray(s)


def _dy_scale(H, reps, hy):
    s = np.full((H, 1), 1.0 / hy, np.float32)
    s[H - 1, 0] = 0.0                      # Neumann: 0 at last row of each plane
    return jnp.asarray(np.tile(s, (reps, 1)))


def _as_list(outs, n_parts):
    if n_parts == 1 and not isinstance(outs, (list, tuple)):
        return [outs]
    return list(outs)


# ---------------------------------------------------------------------------
# dim = 2
# ---------------------------------------------------------------------------
def _nabla2d_pallas(parts, hx, hy, out_dtype, max_block_elems):
    H, W = parts[0].shape
    n_parts = len(parts)
    TH = _choose_units(H, 1, W, _target_elems(n_parts, 2, max_block_elems))
    nb = H // TH
    inv_hy = 1.0 / hy
    dxs = _dx_scale(W, hx)

    # Halo: for tile i, the row that follows the tile (clamped to H-1 so the
    # last tile's boundary difference is exactly 0).  Tiny gather, (nb, 1, W).
    halos = []
    for p in parts:
        idxs = [min((i + 1) * TH, H - 1) for i in range(nb)]
        h = jnp.concatenate([lax.slice_in_dim(p, j, j + 1, axis=0) for j in idxs], axis=0)
        halos.append(h.reshape(nb, 1, W))

    def kernel(*refs):
        dxs_ref = refs[0]
        in_refs = refs[1:1 + 2 * n_parts]
        out_refs = refs[1 + 2 * n_parts:]
        dxsv = dxs_ref[...]                                     # (1, W)
        rowi = lax.broadcasted_iota(jnp.int32, (TH, W), 0)
        for p_i in range(n_parts):
            x = in_refs[2 * p_i][...]                           # (TH, W)
            nxt = in_refs[2 * p_i + 1][0]                       # (1, W) next row (clamped)
            # d/dx: lane-axis forward difference (roll on XLU + masked scale)
            fx = pltpu.roll(x, shift=W - 1, axis=1)             # fx[:, j] = x[:, (j+1)%W]
            out_refs[p_i][0] = ((fx - x) * dxsv).astype(out_dtype)
            # d/dy: sublane-axis forward difference; last tile row uses halo
            fy = pltpu.roll(x, shift=TH - 1, axis=0)            # fy[r] = x[(r+1)%TH]
            fy = jnp.where(rowi == TH - 1, nxt, fy)
            out_refs[p_i][1] = ((fy - x) * inv_hy).astype(out_dtype)

    in_specs = [pl.BlockSpec((1, W), lambda i: (0, 0))]
    args = [dxs]
    for p_i in range(n_parts):
        in_specs.append(pl.BlockSpec((TH, W), lambda i: (i, 0)))
        in_specs.append(pl.BlockSpec((1, 1, W), lambda i: (i, 0, 0)))
        args.extend([parts[p_i], halos[p_i]])

    out_shape = tuple(jax.ShapeDtypeStruct((2, H, W), out_dtype) for _ in range(n_parts))
    out_specs = tuple(pl.BlockSpec((2, TH, W), lambda i: (0, i, 0)) for _ in range(n_parts))

    outs = pl.pallas_call(
        kernel,
        grid=(nb,),
        in_specs=in_specs,
        out_specs=out_specs,
        out_shape=out_shape,
        compiler_params=pltpu.CompilerParams(dimension_semantics=("parallel",)),
    )(*args)
    return _as_list(outs, n_parts)


# ---------------------------------------------------------------------------
# dim = 3
# ---------------------------------------------------------------------------
def _nabla3d_pallas(parts, hx, hy, hz, out_dtype, max_block_elems):
    D, H, W = parts[0].shape
    n_parts = len(parts)
    inv_hz = 1.0 / hz
    dxs = _dx_scale(W, hx)

    if H % 8 == 0:
        # -------- primary path: merged (D*H, W) view, TD planes per tile ----
        TD = _choose_units(D, H, W, _target_elems(n_parts, 3, max_block_elems))
        THR = TD * H
        nb = D // TD
        dys = _dy_scale(H, TD, hy)

        mains, halos = [], []
        for p in parts:
            mains.append(p.reshape(D * H, W))                    # free row-major merge
            idxs = [min((i + 1) * TD, D - 1) for i in range(nb)]
            halos.append(jnp.concatenate(
                [lax.slice_in_dim(p, j, j + 1, axis=0) for j in idxs], axis=0))

        def kernel(*refs):
            dxs_ref, dys_ref = refs[0], refs[1]
            in_refs = refs[2:2 + 2 * n_parts]
            out_refs = refs[2 + 2 * n_parts:]
            dxsv = dxs_ref[...]                                  # (1, W)
            dysv = dys_ref[...]                                  # (THR, 1)
            for p_i in range(n_parts):
                x = in_refs[2 * p_i][...]                        # (THR, W) = TD planes
                nxt = in_refs[2 * p_i + 1][0]                    # (H, W) next plane (clamped)
                # d/dx (lane axis)
                fx = pltpu.roll(x, shift=W - 1, axis=1)
                out_refs[p_i][0] = ((fx - x) * dxsv).astype(out_dtype)
                # d/dy (sublane axis within each plane); plane boundaries
                # zeroed by the periodic dysv scale.
                fy = pltpu.roll(x, shift=THR - 1, axis=0)
                out_refs[p_i][1] = ((fy - x) * dysv).astype(out_dtype)
                # d/dz (plane axis): in-tile planes via roll-by-H, tile's last
                # plane via the halo plane (clamped -> 0 at the volume end).
                if TD > 1:
                    fz = pltpu.roll(x, shift=THR - H, axis=0)    # fz[r] = x[(r+H)%THR]
                    out_refs[p_i][2, 0:THR - H, :] = (
                        (fz[0:THR - H, :] - x[0:THR - H, :]) * inv_hz).astype(out_dtype)
                out_refs[p_i][2, THR - H:THR, :] = (
                    (nxt - x[THR - H:THR, :]) * inv_hz).astype(out_dtype)

        in_specs = [pl.BlockSpec((1, W), lambda i: (0, 0)),
                    pl.BlockSpec((THR, 1), lambda i: (0, 0))]
        args = [dxs, dys]
        for p_i in range(n_parts):
            in_specs.append(pl.BlockSpec((THR, W), lambda i: (i, 0)))
            in_specs.append(pl.BlockSpec((1, H, W), lambda i: (i, 0, 0)))
            args.extend([mains[p_i], halos[p_i]])

        out_shape = tuple(jax.ShapeDtypeStruct((3, D * H, W), out_dtype)
                          for _ in range(n_parts))
        out_specs = tuple(pl.BlockSpec((3, THR, W), lambda i: (0, i, 0))
                          for _ in range(n_parts))

        outs = pl.pallas_call(
            kernel,
            grid=(nb,),
            in_specs=in_specs,
            out_specs=out_specs,
            out_shape=out_shape,
            compiler_params=pltpu.CompilerParams(dimension_semantics=("parallel",)),
        )(*args)
        return [o.reshape(3, D, H, W) for o in _as_list(outs, n_parts)]

    # -------- fallback path: H not a multiple of 8 -> one plane per step ----
    # (still tiled/pipelined; all in-kernel ops are plain 2-D and alignment-free)
    inv_hy = 1.0 / hy

    def kernel(*refs):
        dxs_ref = refs[0]
        in_refs = refs[1:1 + 2 * n_parts]
        out_refs = refs[1 + 2 * n_parts:]
        dxsv = dxs_ref[...]                                      # (1, W)
        for p_i in range(n_parts):
            x = in_refs[2 * p_i][0]                              # (H, W) current plane
            xn = in_refs[2 * p_i + 1][0]                         # (H, W) next plane (clamped)
            fx = pltpu.roll(x, shift=W - 1, axis=1)
            out_refs[p_i][0, 0] = ((fx - x) * dxsv).astype(out_dtype)
            # replicate-last-row shift: boundary difference is exactly 0
            fy = jnp.concatenate([x[1:, :], x[-1:, :]], axis=0)
            out_refs[p_i][1, 0] = ((fy - x) * inv_hy).astype(out_dtype)
            out_refs[p_i][2, 0] = ((xn - x) * inv_hz).astype(out_dtype)

    in_specs = [pl.BlockSpec((1, W), lambda i: (0, 0))]
    args = [dxs]
    for p_i in range(n_parts):
        in_specs.append(pl.BlockSpec((1, H, W), lambda i: (i, 0, 0)))
        in_specs.append(pl.BlockSpec((1, H, W),
                                     lambda i: (jnp.minimum(i + 1, D - 1), 0, 0)))
        args.extend([parts[p_i], parts[p_i]])

    out_shape = tuple(jax.ShapeDtypeStruct((3, D, H, W), out_dtype) for _ in range(n_parts))
    out_specs = tuple(pl.BlockSpec((3, 1, H, W), lambda i: (0, i, 0, 0))
                      for _ in range(n_parts))

    outs = pl.pallas_call(
        kernel,
        grid=(D,),
        in_specs=in_specs,
        out_specs=out_specs,
        out_shape=out_shape,
        compiler_params=pltpu.CompilerParams(dimension_semantics=("parallel",)),
    )(*args)
    return _as_list(outs, n_parts)


# ---------------------------------------------------------------------------
# public wrapper
# ---------------------------------------------------------------------------
def nabla_forward(x, dim, hx=1.0, hy=1.0, hz=1.0, ht=1.0,
                  out_dtype=None, max_block_elems=None):
    if dim not in (2, 3):
        # TODO(synk): dim=4 (x,y,z,t) variant not implemented; same tiling pattern extends with ht.
        raise NotImplementedError("Only dim in {2, 3} is implemented in the Pallas kernel.")
    assert x.ndim == dim, f"expected a {dim}-D array, got shape {x.shape}"

    is_complex = jnp.iscomplexobj(x)
    parts = [jnp.real(x), jnp.imag(x)] if is_complex else [x]
    odt = parts[0].dtype if (out_dtype is None or is_complex) else jnp.dtype(out_dtype)

    if dim == 2:
        outs = _nabla2d_pallas(parts, float(hx), float(hy), odt, max_block_elems)
    else:
        outs = _nabla3d_pallas(parts, float(hx), float(hy), float(hz), odt, max_block_elems)

    if is_complex:
        return lax.complex(outs[0], outs[1])
    return outs[0]


class Nabla:
    """JAX/Pallas port of optoth.nabla.Nabla (forward pass).

    TODO(synk): adjoint (divergence) operator and float64/complex128 are not
    implemented (TPU Pallas has no f64 path).
    """

    def __init__(self, dim, hx=1, hy=1, hz=1, ht=1,
                 out_dtype=None, max_block_elems=None):
        self.dim = dim
        self.hx = float(hx)
        self.hy = float(hy)
        self.hz = float(hz)
        self.ht = float(ht)
        self.out_dtype = out_dtype
        self.max_block_elems = max_block_elems

    def forward(self, x):
        return nabla_forward(x, self.dim, self.hx, self.hy, self.hz, self.ht,
                             out_dtype=self.out_dtype,
                             max_block_elems=self.max_block_elems)

    __call__ = forward


# ---------------------------------------------------------------------------
# pure-JAX reference for verification
# ---------------------------------------------------------------------------
def _nabla_ref(x, dim, hx, hy, hz):
    def fdiff(a, axis, h):
        nxt = jnp.concatenate(
            [lax.slice_in_dim(a, 1, a.shape[axis], axis=axis),
             lax.slice_in_dim(a, a.shape[axis] - 1, a.shape[axis], axis=axis)],
            axis=axis)
        return (nxt - a) / h

    if dim == 2:
        return jnp.stack([fdiff(x, 1, hx), fdiff(x, 0, hy)], axis=0)
    elif dim == 3:
        return jnp.stack([fdiff(x, 2, hx), fdiff(x, 1, hy), fdiff(x, 0, hz)], axis=0)
    raise NotImplementedError


if __name__ == "__main__":
    key = jax.random.PRNGKey(0)
    k2, k3r, k3i, k4 = jax.random.split(key, 4)

    # dim=2, real float32 -- small blocks forced so the multi-tile + halo path runs
    H, W = 64, 128
    x2 = jax.random.normal(k2, (H, W), dtype=jnp.float32)
    op2 = Nabla(dim=2, hx=1.0, hy=2.0, max_block_elems=8 * W)     # TH=8 -> 8 grid steps
    out2 = jax.block_until_ready(op2(x2))
    ref2 = _nabla_ref(x2, 2, 1.0, 2.0, 1.0)
    np.testing.assert_allclose(np.asarray(out2), np.asarray(ref2), rtol=1e-5, atol=1e-5)
    assert out2.shape == (2, H, W) and out2.dtype == jnp.float32

    # dim=3, complex64 -- fused real/imag in one pallas_call, tiled over D with halo planes
    D, H3, W3 = 8, 16, 128
    x3 = (jax.random.normal(k3r, (D, H3, W3), dtype=jnp.float32)
          + 1j * jax.random.normal(k3i, (D, H3, W3), dtype=jnp.float32)).astype(jnp.complex64)
    op3 = Nabla(dim=3, hx=1.0, hy=1.0, hz=3.0, max_block_elems=2 * H3 * W3)  # TD=2 -> 4 steps
    out3 = jax.block_until_ready(op3(x3))
    ref3 = _nabla_ref(x3, 3, 1.0, 1.0, 3.0)
    np.testing.assert_allclose(np.asarray(out3), np.asarray(ref3), rtol=1e-5, atol=1e-5)
    assert out3.shape == (3, D, H3, W3) and out3.dtype == jnp.complex64

    # dim=3, real float32, H not a multiple of 8 -> per-plane fallback path
    x3b = jax.random.normal(k4, (4, 12, 16), dtype=jnp.float32)
    op3b = Nabla(dim=3, hx=0.5, hy=1.0, hz=2.0)
    out3b = jax.block_until_ready(op3b(x3b))
    ref3b = _nabla_ref(x3b, 3, 0.5, 1.0, 2.0)
    np.testing.assert_allclose(np.asarray(out3b), np.asarray(ref3b), rtol=1e-5, atol=1e-5)
    assert out3b.shape == (3, 4, 12, 16)

    print("KERNEL_OK")
</pallas_src>

<mosaic_0001>
module attributes {stable_mosaic.version = 11 : i64} {
  func.func @kernel(%arg0: i32, %arg1: memref<1x128xf32, #tpu.memory_space<vmem>>, %arg2: memref<8x128xf32, #tpu.memory_space<vmem>>, %arg3: memref<1x1x128xf32, #tpu.memory_space<vmem>>, %arg4: memref<2x8x128xf32, #tpu.memory_space<vmem>>) attributes {dimension_semantics = [#tpu.dimension_semantics<parallel>], iteration_bounds = array<i64: 8>, scalar_prefetch = 0 : i64, scratch_operands = 0 : i64, tpu.core_type = #tpu.core_type<tc>, window_params = [{pipeline_mode = #tpu.pipeline_mode<synchronous>, transform_indices = @transform_0, window_bounds = array<i64: 1, 128>}, {transform_indices = @transform_1, window_bounds = array<i64: 8, 128>}, {transform_indices = @transform_2, window_bounds = array<i64: 1, 1, 128>}, {transform_indices = @transform_3, window_bounds = array<i64: 2, 8, 128>}]} {
    %c0 = arith.constant 0 : index
    %c0_0 = arith.constant 0 : index
    %0 = vector.load %arg1[%c0, %c0_0] : memref<1x128xf32, #tpu.memory_space<vmem>>, vector<1x128xf32>
    %1 = tpu.iota {dimensions = array<i32: 0>} : vector<8x128xi32>
    %c0_1 = arith.constant 0 : index
    %c0_2 = arith.constant 0 : index
    %2 = vector.load %arg2[%c0_1, %c0_2] : memref<8x128xf32, #tpu.memory_space<vmem>>, vector<8x128xf32>
    %c0_3 = arith.constant 0 : index
    %c0_4 = arith.constant 0 : index
    %c0_5 = arith.constant 0 : index
    %3 = vector.load %arg3[%c0_3, %c0_4, %c0_5] : memref<1x1x128xf32, #tpu.memory_space<vmem>>, vector<1x1x128xf32>
    %4 = vector.shape_cast %3 : vector<1x1x128xf32> to vector<1x128xf32>
    %c127_i32 = arith.constant 127 : i32
    %5 = tpu.dynamic_rotate %2 by %c127_i32 dim 1 : vector<8x128xf32>, i32 -> vector<8x128xf32>
    %6 = arith.subf %5, %2 : vector<8x128xf32>
    %7 = vector.broadcast %0 : vector<1x128xf32> to vector<8x128xf32>
    %8 = arith.mulf %6, %7 : vector<8x128xf32>
    %c0_6 = arith.constant 0 : index
    %c0_7 = arith.constant 0 : index
    %c0_8 = arith.constant 0 : index
    %9 = vector.load %arg4[%c0_6, %c0_7, %c0_8] : memref<2x8x128xf32, #tpu.memory_space<vmem>>, vector<1x8x128xf32>
    %10 = vector.shape_cast %9 : vector<1x8x128xf32> to vector<8x128xf32>
    %11 = vector.shape_cast %8 : vector<8x128xf32> to vector<1x8x128xf32>
    tpu.vector_store %arg4[%c0_6, %c0_7, %c0_8], %11 {strides = array<i32>} : memref<2x8x128xf32, #tpu.memory_space<vmem>>, vector<1x8x128xf32>,
    %c7_i32 = arith.constant 7 : i32
    %12 = tpu.dynamic_rotate %2 by %c7_i32 dim 0 : vector<8x128xf32>, i32 -> vector<8x128xf32>
    %c7_i32_9 = arith.constant 7 : i32
    %13 = vector.broadcast %c7_i32_9 : i32 to vector<8x128xi32>
    %14 = arith.cmpi eq, %1, %13 : vector<8x128xi32>
    %15 = vector.shape_cast %4 : vector<1x128xf32> to vector<1x128xf32>
    %16 = vector.broadcast %15 : vector<1x128xf32> to vector<8x128xf32>
    %17 = arith.select %14, %16, %12 : vector<8x128xi1>, vector<8x128xf32>
    %18 = arith.subf %17, %2 : vector<8x128xf32>
    %cst = arith.constant 5.000000e-01 : f32
    %19 = vector.broadcast %cst : f32 to vector<8x128xf32>
    %20 = arith.mulf %18, %19 : vector<8x128xf32>
    %c1 = arith.constant 1 : index
    %c0_10 = arith.constant 0 : index
    %c0_11 = arith.constant 0 : index
    %21 = vector.load %arg4[%c1, %c0_10, %c0_11] : memref<2x8x128xf32, #tpu.memory_space<vmem>>, vector<1x8x128xf32>
    %22 = vector.shape_cast %21 : vector<1x8x128xf32> to vector<8x128xf32>
    %23 = vector.shape_cast %20 : vector<8x128xf32> to vector<1x8x128xf32>
    tpu.vector_store %arg4[%c1, %c0_10, %c0_11], %23 {strides = array<i32>} : memref<2x8x128xf32, #tpu.memory_space<vmem>>, vector<1x8x128xf32>,
    return
  }
  func.func @transform_0(%arg0: i32) -> (i32, i32) {
    %c0_i32 = arith.constant 0 : i32
    %c0_i32_0 = arith.constant 0 : i32
    %c0_i32_1 = arith.constant 0 : i32
    return %c0_i32, %c0_i32_0 : i32, i32
  }
  func.func @transform_1(%arg0: i32) -> (i32, i32) {
    %c0_i32 = arith.constant 0 : i32
    %c0_i32_0 = arith.constant 0 : i32
    return %arg0, %c0_i32 : i32, i32
  }
  func.func @transform_2(%arg0: i32) -> (i32, i32, i32) {
    %c0_i32 = arith.constant 0 : i32
    %c0_i32_0 = arith.constant 0 : i32
    %c0_i32_1 = arith.constant 0 : i32
    return %arg0, %c0_i32, %c0_i32_0 : i32, i32, i32
  }
  func.func @transform_3(%arg0: i32) -> (i32, i32, i32) {
    %c0_i32 = arith.constant 0 : i32
    %c0_i32_0 = arith.constant 0 : i32
    %c0_i32_1 = arith.constant 0 : i32
    return %c0_i32, %arg0, %c0_i32_0 : i32, i32, i32
  }
}

</mosaic_0001>

<bundles_post_ra>
// kernel: tpu_custom_call.1
= control target key start
LH: loop header
LB: loop body
LE: loop exit
PB: predicated region body
PF: predicated region fallthrough
CT: control target
= control target key end

     0   :  { %8 = vsyncpa [#allocation3], 0  ;;  %s857_s0 = inlined_call_operand.hbm [shape: f32[1,128], index: 0, kind: input, shape index: {}]   ;;  %s858_s1 = inlined_call_operand.hbm [shape: f32[64,128], index: 1, kind: input, shape index: {}]   ;;  %s859_s2 = inlined_call_operand.hbm [shape: f32[8,1,128], index: 2, kind: input, shape index: {}]   ;;  %s860_s3 = inlined_call_operand.hbm [shape: f32[2,64,128], index: 3, kind: output, shape index: {}]  }
   0x1   :  { %9 = vsyncpa [#allocation6], 0 }
   0x2   :  { %11 = vsyncpa [#allocation6 + $0x1], 0 }
   0x3   :  { %12 = vsyncpa [#allocation4], 0 }
   0x4   :  { %14 = vsyncpa [#allocation4 + $0x1], 0  ;;  %s638_s12 = smov 0   ;;  %s640_s13 = smov 0  }
   0x5   :  { %s642_s14 = smov 0   ;;  %s644_s15 = smov 0  }
   0x6 LB: > { %s659_s16 = sadd.s32 1, %s608_s15   ;;  %s48_s17 = sadd.s32 1, %s604_s14  ;;  %s608_s15 = sphi %s644_s15, %s884_s15   ;;  %s604_s14 = sphi %s642_s14, %s883_s14   ;;  %s600_s13 = sphi %s640_s13, %s882_s13   ;;  %s596_s12 = sphi %s638_s12, %s881_s12  }
   0x7   : > { %s45_s18 = ssub.s32 %s608_s15, %s659_s16  ;;  %p861_p0 = scmp.ne.s32.totalorder %s604_s14, %s600_s13 }
   0x8   : > { %p46_p1 = scmp.eq.s32.totalorder %s45_s18, 0  ;;  %p56_p2 = scmp.eq.s32.totalorder %s608_s15, 0 }
   0x9   : > { %p418_p3 = scmp.lt.s32.totalorder %s608_s15, 8  ;;  %s148_s20 = sand.u32 1, %s608_s15  }
   0xa   : > { %s669_s19 = scalar_select %p46_p1, %s604_s14, %s48_s17  }
   0xb   : > { %p57_p4 = por %p56_p2, %p861_p0  ;;  %s150_s21 = sand.u32 1, %s604_s14  }
   0xc   : > { %s378_s22 = sshll.u32 %s150_s21, 3  ;;  %s379_s23 = sshll.u32 %s608_s15, 7 }
   0xd   : > { %s682_s26 = scalar_lea.hbm %s858_s1, %s379_s23  ;;  %s152_s27 = scalar_lea.vmem [#allocation5], %s378_s22 }
   0xe   : > { %s159_s28 = sshll.u32 %s152_s27, 4  ;;  %p684_p5 = pnand %p418_p3, %p57_p4  ;;  %s160_s28 = int_to_ptr.vmem [resolvable:$true] %s159_s28 }
   0xf   : > { %s688_s30 = scalar_lea.sflag [#allocation6], %s148_s20  ;;  %s458_s4 = scalar_lea.hbm %s682_s26, 128 }
  0x10   : > { %p459_p6 = scmp.ne.s32.totalorder %s682_s26, %s458_s4  ;;  %p460_p7 = pneg %p684_p5 }
  0x11   : > { %s463_s7 = scalar_lea.hbm %s858_s1, 1024  ;;  %p464_p10 = scmp.lt.s32.totalorder %s682_s26, %s858_s1 }
  0x12   : > { %p461_p8 = pnand %p460_p7, %p459_p6  ;;  %p465_p11 = scmp.lt.s32.totalorder %s463_s7, %s458_s4 }
  0x14   : > { %p462_p9 = pneg %p461_p8  ;;  %p466_p12 = por %p465_p11, %p464_p10 }
  0x16   : > { %p467_p13 = pnand %p466_p12, %p462_p9 }
  0x18   : > { %470 = shalt.err (!%p467_p13)
}
  0x19   : > { %s471_s10 = scalar_lea.vmem %s160_s28, 128  ;;  %s610_s11 = smov [#allocation5]  }
  0x1a   : > { %p472_p1 = scmp.ne.s32.totalorder %s160_s28, %s471_s10  ;;  %s476_s17 = sshll.u32 %s610_s11, 4  ;;  %s477_s17 = int_to_ptr.vmem [resolvable:$false] %s476_s17 }
  0x1b   : > { %s478_s18 = scalar_lea.vmem %s477_s17, 256  ;;  %p479_p4 = scmp.lt.s32.totalorder %s160_s28, %s477_s17 }
  0x1c   : > { %p474_p2 = pnand %p472_p1, %p460_p7  ;;  %p480_p6 = scmp.lt.s32.totalorder %s478_s18, %s471_s10 }
  0x1e   : > { %p475_p3 = pneg %p474_p2  ;;  %p481_p8 = por %p480_p6, %p479_p4 }
  0x20   : > { %p482_p0 = pnand %p481_p8, %p475_p3 }
  0x22   : > { %485 = shalt.err (!%p482_p0)
}
  0x23   : > { %409 = dma.hbm_to_vmem [thread:$0]  (!%p684_p5), %s682_s26, 128, %s160_s28, %s688_s30  }
  0x24   : > { %s712_s20 = sadd.s32 4294967295, %s608_s15   ;;  %s374_s22 = sadd.s32 4294967294, %s608_s15  }
  0x25   : > { %p61_p0 = scmp.ne.s32.totalorder %s600_s13, %s596_s12  ;;  %p862_p9 = scmp.eq.s32.totalorder %s712_s20, 0 }
  0x26   : > { %p111_p10 = scmp.eq.s32.totalorder %s712_s20, 7  ;;  %p117_p11 = scmp.eq.s32.totalorder %s374_s22, 7 }
  0x27   : > { %p721_p12 = por %p862_p9, %p61_p0  ;;  %p375_p13 = scmp.ge.s32.totalorder %s608_s15, 1 }
  0x28   : > { %p869_p1 = scmp.ne.s32.totalorder %s604_s14, %s600_s13  ;;  %p733_p3 = por %p117_p11, %p61_p0 }
  0x29   : > { %s868_s23 = scalar_select %p721_p12, 1, 0 }
  0x2a   : > { %p729_p2 = por %p111_p10, %p869_p1  ;;  %p124_p4 = scmp.lt.s32.totalorder %s608_s15, 9 }
  0x2b   : > { %s871_s25 = scalar_select %p733_p3, 1, 0 }
  0x2c   : > { %s870_s24 = scalar_select %p729_p2, 1, 0 }
  0x2d   : > { %p738_p6 = pnand %p375_p13, %p124_p4  ;;  %s611_s27 = smov [#allocation2]  }
  0x2e   : > { %s137_s28 = sshll.u32 %s611_s27, 4  ;;  %s380_s4 = sshll.u32 %s608_s15, 4  ;;  %s750_s28 = int_to_ptr.vmem [resolvable:$true] %s137_s28 }
  0x2f   : > { %s872_s26 = scalar_select %p738_p6, 1, 0 }
  0x30   : > { %p402_p8 = pneg %p738_p6  ;;  %s748_s7 = scalar_lea.hbm %s859_s2, %s380_s4 }
  0x31   : > { %s169_s8 = scalar_lea.vmem [#allocation7], %s150_s21  ;;  %s486_s11 = scalar_lea.hbm %s748_s7, 16 }
  0x32   : > { %s176_s9 = sshll.u32 %s169_s8, 4  ;;  %p756_p0 = pnand %p402_p8, %p862_p9  ;;  %s177_s9 = int_to_ptr.vmem [resolvable:$true] %s176_s9 }
  0x33   : > { %p487_p10 = scmp.ne.s32.totalorder %s748_s7, %s486_s11  ;;  %s491_s22 = scalar_lea.hbm %s859_s2, 128 }
  0x34   : > { %s873_s10 = scalar_select %p756_p0, 1, 0 }
  0x35   : > { %p489_p11 = pnand %p487_p10, %p460_p7  ;;  %p492_p1 = scmp.lt.s32.totalorder %s748_s7, %s859_s2 }
  0x36   : > { %p493_p4 = scmp.lt.s32.totalorder %s491_s22, %s486_s11 }
  0x37   : > { %p490_p13 = pneg %p489_p11 }
  0x38   : > { %p494_p8 = por %p493_p4, %p492_p1 }
  0x3a   : > { %p495_p9 = pnand %p494_p8, %p490_p13 }
  0x3c   : > { %498 = shalt.err (!%p495_p9)
}
  0x3d   : > { %s499_s21 = scalar_lea.vmem %s177_s9, 16  ;;  %s612_s5 = smov [#allocation7]  }
  0x3e   : > { %p500_p3 = scmp.ne.s32.totalorder %s177_s9, %s499_s21  ;;  %s504_s6 = sshll.u32 %s612_s5, 4  ;;  %s505_s6 = int_to_ptr.vmem [resolvable:$false] %s504_s6 }
  0x3f   : > { %s506_s8 = scalar_lea.vmem %s505_s6, 32  ;;  %p507_p11 = scmp.lt.s32.totalorder %s177_s9, %s505_s6 }
  0x40   : > { %p502_p2 = pnand %p500_p3, %p460_p7  ;;  %p508_p12 = scmp.lt.s32.totalorder %s506_s8, %s499_s21 }
  0x42   : > { %p503_p10 = pneg %p502_p2  ;;  %p509_p6 = por %p508_p12, %p507_p11 }
  0x44   : > { %p510_p0 = pnand %p509_p6, %p503_p10 }
  0x46   : > { %513 = shalt.err (!%p510_p0)
}
  0x47   : > { %412 = dma.hbm_to_vmem [thread:$0]  (!%p684_p5), %s748_s7, 16, %s177_s9, %s688_s30  }
  0x48   : > { %p874_p7 = scmp.ne.s32.totalorder %s873_s10, 0  ;;  %s525_s11 = scalar_lea.vmem %s750_s28, 16 }
  0x49   : > { %p526_p2 = scmp.ne.s32.totalorder %s750_s28, %s525_s11  ;;  %s532_s17 = scalar_lea.vmem %s750_s28, 32 }
  0x4a   : > { %p516_p9 = pneg %p874_p7  ;;  %p533_p12 = scmp.lt.s32.totalorder %s750_s28, %s750_s28 }
  0x4b   : > { %p534_p6 = scmp.lt.s32.totalorder %s532_s17, %s525_s11 }
  0x4c   : > { %p528_p3 = pnand %p526_p2, %p516_p9 }
  0x4d   : > { %p535_p0 = por %p534_p6, %p533_p12 }
  0x4e   : > { %p529_p13 = pneg %p528_p3 }
  0x50   : > { %p536_p1 = pnand %p535_p0, %p529_p13 }
  0x52   : > { %539 = shalt.err (!%p536_p1)
}
  0x53   : > { %405 = dma.hbm_to_vmem [thread:$0]  (!%p874_p7), %s857_s0, 16, %s750_s28, [#allocation3]  }
  0x54   : > { %p875_p5 = scmp.ne.s32.totalorder %s872_s26, 0 }
  0x55   : > { %p876_p4 = scmp.eq.s32.totalorder (!%p875_p5), %s712_s20, 0 }
  0x56   : > { %185 = sbr.rel (%p875_p5) target bundleno = 232 (0xe8), region = 32 }
  0x5b   : > { %583 = dma.done.wait (%p876_p4), [#allocation3], 16   ;;  %p877_p8 = pmov %p876_p4 }
  0x5c   : > { %s191_s30 = sand.u32 1, %s712_s20   ;;  %s800_s7 = sand.u32 1, %s600_s13  }
  0x5d   : > { %585 = vsyncadd (%p877_p8), [#allocation3], 4294967280  ;;  %s383_s9 = sshll.u32 %s800_s7, 3  ;;  %s192_s10 = scalar_lea.sflag [#allocation6], %s191_s30 }
  0x5e   : > { %s195_s22 = scalar_lea.vmem [#allocation5], %s383_s9  ;;  %p878_p10 = scmp.ne.s32.totalorder %s868_s23, 0 }
  0x60   : > { %587 = dma.done.wait (%p878_p10), %s192_s10, 144  }
  0x61   : > { %589 = vsyncadd (%p878_p10), %s192_s10, 4294967152  ;;  %v231_v0 = vlaneseq  ;;  %v233_v2 = vld [vmem:[%s195_s22] sm:$0xff]  ;;  %s203_s26 = scalar_lea.vmem [#allocation7], %s800_s7  ;;  %s613_s28 = smov 127   ;;  %v385_v8 = vld [vmem:[#allocation2] ss:$0 sm:$0xff] }
  0x62   : > { %v386_v3 = vld [vmem:[%s203_s26] ss:$0 sm:$0xff]  ;;  %235 = vrot.lane.b32.xlu0 %v233_v2, %s613_s28  ;;  %v246_v4 = vrot.slane %v233_v2, 1  ;;  %s384_s27 = sshll.u32 %s800_s7, 4  ;;  %s389_s21 = sshll.u32 %s712_s20, 7 }
  0x63   : > { %v232_v1 = vshrl.u32 %v231_v0, 7  ;;  %s229_s23 = scalar_lea.vmem [#allocation8], %s384_s27  ;;  %s815_s8 = scalar_lea.hbm %s860_s3, %s389_s21 }
  0x64   : > { %s272_s4 = sshll.u32 %s229_s23, 4  ;;  %s260_s11 = scalar_lea.sflag [#allocation4], %s800_s7  ;;  %s810_s4 = int_to_ptr.vmem [resolvable:$true] %s272_s4 }
  0x65   : > { %vm247_vm0 = vcmp.eq.s32.totalorder %v232_v1, 7  ;;  %s540_s17 = scalar_lea.vmem %s810_s4, 256  ;;  %p879_p7 = scmp.ne.s32.totalorder %s870_s24, 0 }
  0x66   : > { %v254_v5 = vsel %vm247_vm0, %v386_v3, %v246_v4  ;;  %p541_p11 = scmp.ne.s32.totalorder %s810_s4, %s540_s17  ;;  %s614_s20 = smov [#allocation8]  }
  0x67   : > { %v255_v6 = vsub.f32 %v254_v5, %v233_v2  ;;  %s544_s29 = sshll.u32 %s614_s20, 4  ;;  %s545_s29 = int_to_ptr.vmem [resolvable:$false] %s544_s29 }
  0x68   : > { %p542_p9 = pnand %p541_p11, %p879_p7  ;;  %s546_s18 = scalar_lea.vmem %s545_s29, 512 }
  0x69   : > { %v256_v7 = vmul.f32 0.5, %v255_v6  ;;  %p547_p3 = scmp.lt.s32.totalorder %s810_s4, %s545_s29  ;;  %p548_p13 = scmp.lt.s32.totalorder %s546_s18, %s540_s17 }
  0x6a   : > { %p543_p2 = pneg %p542_p9 }
  0x6b   : > { %387 = vst [vmem:[%s229_s23 + $0x8] sm:$0xff] %v256_v7  ;;  %p549_p12 = por %p548_p13, %p547_p3 }
  0x6d   : > { %p550_p6 = pnand %p549_p12, %p543_p2 }
  0xd4   : > { %v236_v9 = vpop.permute.xlu0 %235 }
  0xd5   : > { %v237_v10 = vsub.f32 %v236_v9, %v233_v2 }
  0xd7   : > { %v244_v11 = vmul.f32 %v385_v8, %v237_v10 }
  0xd9   : > { %245 = vst [vmem:[%s229_s23] sm:$0xff] %v244_v11 }
  0xda   : > { %553 = shalt.err (!%p550_p6)
}
  0xdb   : > { %s554_s30 = scalar_lea.hbm %s815_s8, 256  ;;  %s558_s22 = scalar_lea.hbm %s860_s3, 2048 }
  0xdc   : > { %p555_p0 = scmp.ne.s32.totalorder %s815_s8, %s554_s30  ;;  %p559_p4 = scmp.lt.s32.totalorder %s815_s8, %s860_s3 }
  0xdd   : > { %p560_p8 = scmp.lt.s32.totalorder %s558_s22, %s554_s30 }
  0xde   : > { %p556_p1 = pnand %p555_p0, %p879_p7 }
  0xdf   : > { %p561_p10 = por %p560_p8, %p559_p4 }
  0xe0   : > { %p557_p5 = pneg %p556_p1 }
  0xe2   : > { %p562_p11 = pnand %p561_p10, %p557_p5 }
  0xe4   : > { %565 = shalt.err (!%p562_p11)
}
  0xe5   : > { %s615_s27 = smov 128   ;;  %s616_s23 = smov 1024  }
  0xe6   : > { %s617_s21 = smov 8  }
  0xe7   : > { %400 = dma.vmem_to_hbm [thread:$0]  (%p879_p7), %s810_s4, 256, %s815_s8, %s260_s11, %s615_s27, %s616_s23, %s617_s21  }
  0xe8 PF: > { %p420_p9 = scmp.ge.s32.totalorder %s608_s15, 2  ;;  %s287_s5 = sand.u32 1, %s596_s12  }
  0xe9   : > { %p880_p2 = scmp.ne.s32.totalorder %s871_s25, 0  ;;  %s288_s6 = scalar_lea.sflag [#allocation4], %s287_s5 }
  0xeb   : > { %p414_p3 = pnand %p420_p9, %p880_p2 }
  0xed   : > { %p415_p13 = pneg %p414_p3 }
  0xef   : > { %591 = dma.done.wait (%p415_p13), %s288_s6, 256  }
  0xf0   : > { %593 = vsyncadd (%p415_p13), %s288_s6, 4294967040  ;;  %p17_p12 = scmp.ge.s32.totalorder %s659_s16, 10   ;;  %s881_s12 = smov %s600_s13 }
  0xf1   : > { %s882_s13 = smov %s604_s14  ;;  %s883_s14 = smov %s669_s19 }
  0xf2   : > { %s884_s15 = smov %s659_s16  ;;  %19 = sbr.rel (!%p17_p12) target bundleno = 6 (0x6), region = 94 }
  0xf7   :  { %293 = vsyncpa [#allocation3], 1 }
  0xf8   :  { %295 = vsyncpa [#allocation3 + $0x1], 1 }
  0xf9   :  { %296 = vsyncpa [#allocation6], 1 }
  0xfa   :  { %298 = vsyncpa [#allocation6 + $0x1], 1 }
  0xfb   :  { %299 = vsyncpa [#allocation4], 1 }
  0xfc   :  { %301 = vsyncpa [#allocation4 + $0x1], 1 }

</bundles_post_ra>
